<compile_context>
chip_gen: v7x
topology: tpu7x:2x2x1
jax: 0.10.0
libtpu: 0.0.40
codegen_flags: <defaults>
</compile_context>

<pallas_src>
import functools
import math

import jax
import jax.numpy as jnp
from jax.experimental import pallas as pl
from jax.experimental.pallas import tpu as pltpu


def _round_up(v, m):
    return (v + m - 1) // m * m


def _fan_kernel(x_ref, w_ref, b_ref, out_ref, *, p_dim):
    x = x_ref[...]

    # Single fused matmul: [p | glin] = x @ [Wp | Wg] + [bp | bg]
    y = jnp.dot(x, w_ref[...], preferred_element_type=jnp.float32) + b_ref[...]

    p = y[:, :p_dim]
    glin = y[:, p_dim:]

    # Exact (erf) GELU -- matches torch nn.GELU() default.
    inv_sqrt2 = jnp.float32(1.0 / math.sqrt(2.0))
    gelu = glin * 0.5 * (1.0 + jax.lax.erf(glin * inv_sqrt2))

    # Build one lane-dense (block_n, 2P+G) slab and store it with a single wide write.
    out = jnp.concatenate([jnp.cos(p), jnp.sin(p), gelu], axis=-1)
    out_ref[...] = out.astype(out_ref.dtype)


@functools.partial(jax.jit, static_argnames=("block_n",))
def fan_layer(x, wp, bp, wg, bg, *, block_n=512):
    """x: (N, D); wp: (D, P); bp: (P,); wg: (D, G); bg: (G,). Returns (N, 2P + G)."""
    n, d = x.shape
    p_dim = wp.shape[1]
    g_dim = wg.shape[1]
    out_dim = 2 * p_dim + g_dim

    # Fuse the two Linear layers into one wide matmul operand (done once, outside the kernel).
    w = jnp.concatenate([wp, wg], axis=1)                     # (D, P + G)
    b = jnp.concatenate([bp, bg]).reshape(1, p_dim + g_dim)   # (1, P + G)

    # Batch tile: multiple of the sublane minimum, clamped to the (padded) batch.
    sub = 16 if x.dtype == jnp.bfloat16 else 8
    blk = _round_up(min(block_n, _round_up(n, sub)), sub)
    n_pad = _round_up(n, blk)
    if n_pad != n:
        x = jnp.pad(x, ((0, n_pad - n), (0, 0)))

    grid = (n_pad // blk,)

    itemsize = x.dtype.itemsize
    cost = pl.CostEstimate(
        flops=2 * n_pad * d * (p_dim + g_dim) + 6 * n_pad * out_dim,
        transcendentals=n_pad * (2 * p_dim + g_dim),          # cos + sin + erf per element
        bytes_accessed=(x.size + w.size + b.size + n_pad * out_dim) * itemsize,
    )

    out = pl.pallas_call(
        functools.partial(_fan_kernel, p_dim=p_dim),
        out_shape=jax.ShapeDtypeStruct((n_pad, out_dim), x.dtype),
        grid_spec=pltpu.PrefetchScalarGridSpec(
            num_scalar_prefetch=0,
            grid=grid,
            in_specs=[
                pl.BlockSpec((blk, d), lambda i: (i, 0)),                # x tile
                pl.BlockSpec((d, p_dim + g_dim), lambda i: (0, 0)),      # fused W (resident)
                pl.BlockSpec((1, p_dim + g_dim), lambda i: (0, 0)),      # fused bias
            ],
            out_specs=pl.BlockSpec((blk, out_dim), lambda i: (i, 0)),    # fused, lane-dense out
        ),
        compiler_params=pltpu.CompilerParams(
            dimension_semantics=("parallel",)),
        cost_estimate=cost,
    )(x, w, b)

    return out[:n] if n_pad != n else out


def init_fan_params(key, input_dim, output_dim, dtype=jnp.float32):
    """Deterministic synthetic init matching the nn.Linear shapes of FANLayer.

    Weights stored transposed ((in, out)) relative to torch's (out, in)."""
    p_dim = output_dim // 4
    g_dim = output_dim - output_dim // 2
    k1, k2, k3, k4 = jax.random.split(key, 4)
    bound = 1.0 / math.sqrt(input_dim)
    wp = jax.random.uniform(k1, (input_dim, p_dim), dtype, -bound, bound)
    bp = jax.random.uniform(k2, (p_dim,), dtype, -bound, bound)
    wg = jax.random.uniform(k3, (input_dim, g_dim), dtype, -bound, bound)
    bg = jax.random.uniform(k4, (g_dim,), dtype, -bound, bound)
    return wp, bp, wg, bg


def fan_layer_ref(x, wp, bp, wg, bg):
    """Pure-JAX reference (mirrors the PyTorch forward)."""
    p = x @ wp + bp
    g = jax.nn.gelu(x @ wg + bg, approximate=False)
    return jnp.concatenate([jnp.cos(p), jnp.sin(p), g], axis=-1)


if __name__ == "__main__":
    batch, input_dim, output_dim = 16, 32, 256  # -> p_dim=64, g_dim=128, out=256

    key = jax.random.PRNGKey(0)
    kx, kw = jax.random.split(key)
    x = jax.random.normal(kx, (batch, input_dim), dtype=jnp.float32)
    wp, bp, wg, bg = init_fan_params(kw, input_dim, output_dim)

    out = fan_layer(x, wp, bp, wg, bg)
    out = jax.block_until_ready(out)

    ref = fan_layer_ref(x, wp, bp, wg, bg)
    expected_cols = 2 * (output_dim // 4) + (output_dim - output_dim // 2)
    assert out.shape == (batch, expected_cols), out.shape
    assert jnp.allclose(out, ref, atol=1e-5, rtol=1e-5), "mismatch vs reference"

    print("KERNEL_OK")
</pallas_src>

<mosaic_0001>
module attributes {stable_mosaic.version = 11 : i64} {
  func.func @_fan_kernel(%arg0: i32, %arg1: memref<16x32xf32, #tpu.memory_space<vmem>>, %arg2: memref<32x192xf32, #tpu.memory_space<vmem>>, %arg3: memref<1x192xf32, #tpu.memory_space<vmem>>, %arg4: memref<16x256xf32, #tpu.memory_space<vmem>>) attributes {dimension_semantics = [#tpu.dimension_semantics<parallel>], iteration_bounds = array<i64: 1>, scalar_prefetch = 0 : i64, scratch_operands = 0 : i64, tpu.core_type = #tpu.core_type<tc>, window_params = [{transform_indices = @transform_0, window_bounds = array<i64: 16, 32>}, {pipeline_mode = #tpu.pipeline_mode<synchronous>, transform_indices = @transform_1, window_bounds = array<i64: 32, 192>}, {pipeline_mode = #tpu.pipeline_mode<synchronous>, transform_indices = @transform_2, window_bounds = array<i64: 1, 192>}, {transform_indices = @transform_3, window_bounds = array<i64: 16, 256>}]} {
    %c0 = arith.constant 0 : index
    %c0_0 = arith.constant 0 : index
    %0 = vector.load %arg1[%c0, %c0_0] : memref<16x32xf32, #tpu.memory_space<vmem>>, vector<16x32xf32>
    %c0_1 = arith.constant 0 : index
    %c0_2 = arith.constant 0 : index
    %1 = vector.load %arg2[%c0_1, %c0_2] : memref<32x192xf32, #tpu.memory_space<vmem>>, vector<32x192xf32>
    %cst = arith.constant dense<0.000000e+00> : vector<16x192xf32>
    %2 = tpu.matmul %0, %1, %cst {dimension_numbers = #tpu.dot_dimension_numbers<[1], [0], [0], [1], [0, 0, 1, 1], [], []>} : vector<16x32xf32>, vector<32x192xf32>, vector<16x192xf32> -> vector<16x192xf32>
    %c0_3 = arith.constant 0 : index
    %c0_4 = arith.constant 0 : index
    %3 = vector.load %arg3[%c0_3, %c0_4] : memref<1x192xf32, #tpu.memory_space<vmem>>, vector<1x192xf32>
    %4 = vector.broadcast %3 : vector<1x192xf32> to vector<16x192xf32>
    %5 = arith.addf %2, %4 : vector<16x192xf32>
    %6 = vector.extract_strided_slice %5 {offsets = [0, 0], sizes = [16, 64], strides = [1, 1]} : vector<16x192xf32> to vector<16x64xf32>
    %7 = vector.extract_strided_slice %5 {offsets = [0, 64], sizes = [16, 128], strides = [1, 1]} : vector<16x192xf32> to vector<16x128xf32>
    %cst_5 = arith.constant 5.000000e-01 : f32
    %8 = vector.broadcast %cst_5 : f32 to vector<16x128xf32>
    %9 = arith.mulf %7, %8 : vector<16x128xf32>
    %cst_6 = arith.constant 0.707106769 : f32
    %10 = vector.broadcast %cst_6 : f32 to vector<16x128xf32>
    %11 = arith.mulf %7, %10 : vector<16x128xf32>
    %12 = math.erf %11 : vector<16x128xf32>
    %cst_7 = arith.constant 1.000000e+00 : f32
    %13 = vector.broadcast %cst_7 : f32 to vector<16x128xf32>
    %14 = arith.addf %13, %12 : vector<16x128xf32>
    %15 = arith.mulf %9, %14 : vector<16x128xf32>
    %16 = math.cos %6 : vector<16x64xf32>
    %17 = math.sin %6 : vector<16x64xf32>
    %18 = tpu.concatenate %16, %17, %15 in 1 : vector<16x64xf32>, vector<16x64xf32>, vector<16x128xf32> -> vector<16x256xf32>
    %c0_8 = arith.constant 0 : index
    %c0_9 = arith.constant 0 : index
    %19 = vector.load %arg4[%c0_8, %c0_9] : memref<16x256xf32, #tpu.memory_space<vmem>>, vector<16x256xf32>
    tpu.vector_store %arg4[%c0_8, %c0_9], %18 {strides = array<i32>} : memref<16x256xf32, #tpu.memory_space<vmem>>, vector<16x256xf32>,
    return
  }
  func.func @transform_0(%arg0: i32) -> (i32, i32) {
    %c0_i32 = arith.constant 0 : i32
    %c0_i32_0 = arith.constant 0 : i32
    return %arg0, %c0_i32 : i32, i32
  }
  func.func @transform_1(%arg0: i32) -> (i32, i32) {
    %c0_i32 = arith.constant 0 : i32
    %c0_i32_0 = arith.constant 0 : i32
    %c0_i32_1 = arith.constant 0 : i32
    return %c0_i32, %c0_i32_0 : i32, i32
  }
  func.func @transform_2(%arg0: i32) -> (i32, i32) {
    %c0_i32 = arith.constant 0 : i32
    %c0_i32_0 = arith.constant 0 : i32
    %c0_i32_1 = arith.constant 0 : i32
    return %c0_i32, %c0_i32_0 : i32, i32
  }
  func.func @transform_3(%arg0: i32) -> (i32, i32) {
    %c0_i32 = arith.constant 0 : i32
    %c0_i32_0 = arith.constant 0 : i32
    return %arg0, %c0_i32 : i32, i32
  }
}

</mosaic_0001>

<bundles_post_ra>
// kernel: fan_layer.1
= control target key start
LH: loop header
LB: loop body
LE: loop exit
PB: predicated region body
PF: predicated region fallthrough
CT: control target
= control target key end

     0   :  { %v691_v7 = vmov 0.0   ;;  %s902_s0 = inlined_call_operand.vmem [shape: f32[16,32], index: 0, kind: input, shape index: {}]   ;;  %s903_s1 = inlined_call_operand.vmem [shape: f32[32,192], index: 1, kind: input, shape index: {}]   ;;  %s904_s2 = inlined_call_operand.vmem [shape: f32[1,192], index: 2, kind: input, shape index: {}]   ;;  %s905_s3 = inlined_call_operand.hbm [shape: f32[16,256], index: 3, kind: output, shape index: {}]  }
   0x1   :  { %v18_v0 = vld [vmem:[%s903_s1 + $0x8] sm:$0xff]  ;;  %v20_v1 = vld [vmem:[%s903_s1 + $0x18] sm:$0xff]  ;;  %v17_v2 = vld [vmem:[%s903_s1] sm:$0xff]  ;;  %108 = vmatprep.mubr.f32.mxu0 %v691_v7  ;;  %114 = vmatprep.mubr.f32.mxu1 %v691_v7 }
   0x2   :  { %v620_v3 = vpack.c.bf16 %v20_v1, %v18_v0  ;;  %v19_v4 = vld [vmem:[%s903_s1 + $0x10] sm:$0xff]  ;;  %v22_v5 = vld [vmem:[%s903_s1 + $0x28] sm:$0xff]  ;;  %v24_v6 = vld [vmem:[%s903_s1 + $0x38] sm:$0xff] }
   0x3   :  { %v622_v8 = vpack.c.bf16 %v19_v4, %v17_v2  ;;  %v624_v9 = vpack.c.bf16 %v24_v6, %v22_v5  ;;  %v21_v10 = vld [vmem:[%s903_s1 + $0x20] sm:$0xff]  ;;  %v23_v11 = vld [vmem:[%s903_s1 + $0x30] sm:$0xff] }
   0x4   :  { %621 = vmatprep.subr.bf16.mxu0 %v620_v3  ;;  %628 = vmatprep.subr.bf16.mxu1 %v620_v3 }
   0x5   :  { %8 = vsyncpa [#allocation3], 0  ;;  %623 = vmatpush1.bf16.msra.mxu0 %v622_v8  ;;  %630 = vmatpush1.bf16.msra.mxu1 %v622_v8  ;;  %v626_v12 = vpack.c.bf16 %v23_v11, %v21_v10  ;;  %v15_v13 = vld [vmem:[%s902_s0] sm:$0xff]  ;;  %vm37_vm0 = vcmask 261120   ;;  %v16_v14 = vld [vmem:[%s902_s0 + $0x8] sm:$0xff]  ;;  %v27_v15 = vlaneseq  ;;  %s698_s0 = smov 64  }
   0x6   :  { %625 = vmatprep.subr.bf16.mxu0 %v624_v9  ;;  %629 = vmatprep.subr.bf16.mxu1 %v624_v9  ;;  %v25_v18 = vld [vmem:[%s904_s2] sm:$0x3]  ;;  %v692_v58 = vmov 683565275   ;;  %v693_v60 = vmov 2475754826  }
   0x7   :  { %v28_v16 = vshrl.u32 %v27_v15, 7  ;;  %v694_v0 = vmov 2131351028   ;;  %v695_v2 = vmov 2102212464   ;;  %s699_s2 = smov [#allocation2]  }
   0x8   :  { %v696_v4 = vmov 920167782   ;;  %s591_s6 = sshll.u32 %s699_s2, 4  ;;  %s592_s6 = int_to_ptr.vmem [resolvable:$true] %s591_s6 }
   0x9   :  { %627 = vmatpush1.bf16.msra.mxu0 %v626_v12  ;;  %631 = vmatpush1.bf16.msra.mxu1 %v626_v12  ;;  %v29_v17 = vsub.s32 0, %v28_v16  ;;  %v33_v19 = vsub.s32 1, %v28_v16  ;;  %s667_s7 = scalar_lea.vmem %s592_s6, 512  ;;  %p672_p1 = scmp.lt.s32.totalorder %s592_s6, %s592_s6 }
   0xa   :  { %p668_p0 = scmp.ne.s32.totalorder %s592_s6, %s667_s7  ;;  %p673_p2 = scmp.lt.s32.totalorder %s667_s7, %s667_s7 }
   0xb   :  { %v30_v20 = vrot.slane %v25_v18, %v29_v17  ;;  %v34_v21 = vrot.slane %v25_v18, %v33_v19  ;;  %v697_v17 = vmov 1326507024  }
   0xc   :  { %602 = vmatmul.mubr.msk.f32.vlgmr.msra.gmra.mrb[0].mxu0 %vm37_vm0, %v15_v13  ;;  %603 = vmatmul.mubr.msk.f32.vlgmr.msra.gmra.mrb[0].mxu1 %vm37_vm0, %v16_v14  ;;  %p674_p3 = por %p673_p2, %p672_p1 }
   0xe   :  { %p675_p4 = pnand %p674_p3, %p668_p0 }
  0xdf   :  { %v110_v22 = vpop.f32.mrb[0].mxu0  ;;  %v116_v23 = vpop.f32.mrb[0].mxu1 }
  0xe0   :  { %v755_v24 = vadd.f32 %v110_v22, %v30_v20  ;;  %v757_v25 = vadd.f32 %v116_v23, %v30_v20  ;;  %v112_v26 = vpop.f32.mrb[1].mxu0  ;;  %v118_v27 = vpop.f32.mrb[1].mxu1 }
  0xe1   :  { %v113_v28 = vadd.f32 %v112_v26, %v34_v21  ;;  %v119_v29 = vadd.f32 %v118_v27, %v34_v21 }
  0xe2   :  { %v144_v30 = vand.u32 2139095040, %v755_v24  ;;  %v247_v31 = vand.u32 2139095040, %v757_v25  ;;  %v125_v32 = vmul.f32 0.70710677, %v755_v24  ;;  %v141_v37 = vand.u32 2147483647, %v755_v24 }
  0xe3   :  { %v126_v33 = vmul.f32 0.70710677, %v113_v28  ;;  %v128_v34 = vmul.f32 0.70710677, %v119_v29  ;;  %v244_v38 = vand.u32 2147483647, %v757_v25 }
  0xe4   :  { %v145_v35 = vshrl.u32 %v144_v30, 23  ;;  %v248_v36 = vshrl.u32 %v247_v31, 23  ;;  %651 = verf.f32 %v125_v32  ;;  %v148_v41 = vand.u32 8388607, %v141_v37 }
  0xe5   :  { %653 = verf.f32 %v126_v33  ;;  %v768_v45 = vand.u32 8388607, %v244_v38  ;;  %v121_v50 = vmul.f32 0.5, %v755_v24  ;;  %v122_v51 = vmul.f32 0.5, %v113_v28 }
  0xe6   :  { %v604_v39 = vadd.s32 4294967169, %v145_v35  ;;  %v608_v40 = vadd.s32 4294967169, %v248_v36  ;;  %655 = verf.f32 %v128_v34  ;;  %v149_v44 = vor.u32 8388608, %v148_v41 }
  0xe7   :  { %v124_v52 = vmul.f32 0.5, %v119_v29  ;;  %v252_v54 = vor.u32 8388608, %v768_v45  ;;  %vm847_vm12 = vcmp.le.f32.partialorder %v141_v37, 0.7853982  ;;  %vm143_vm13 = vcmp.lt.s32.totalorder %v755_v24, 0 }
  0xe8   :  { %v151_v42 = vadd.s32 1, %v604_v39  ;;  %v254_v43 = vadd.s32 1, %v608_v40  ;;  %v773_v53 = vshll.u32 %v149_v44, 8 }
  0xea   :  { %vm152_vm1 = vcmp.gt.s32.totalorder %v151_v42, 0  ;;  %vm255_vm2 = vcmp.gt.s32.totalorder %v254_v43, 0 }
  0xeb   :  { %v153_v46 = vsel %vm152_vm1, %v151_v42, 0  ;;  %v256_v47 = vsel %vm255_vm2, %v254_v43, 0  ;;  %vm871_vm1 = vcmp.le.f32.partialorder %v244_v38, 0.7853982 }
  0xec   :  { %v770_v48 = vshrl.u32 %v153_v46, 5  ;;  %v155_v49 = vand.u32 31, %v153_v46  ;;  %v776_v56 = vand.u32 31, %v256_v47  ;;  %v792_v34 = vshrl.u32 %v256_v47, 5 }
  0xee   :  { %v652_v55 = vpop.eup %651  ;;  %v156_v57 = vsub.s32 32, %v155_v49  ;;  %v158_v59 = vshll.u32 %v692_v58, %v155_v49  ;;  %v161_v61 = vshll.u32 %v693_v60, %v155_v49  ;;  %v164_v1 = vshll.u32 %v694_v0, %v155_v49 }
  0xef   :  { %v654_v62 = vpop.eup %653  ;;  %v133_v63 = vadd.f32 1.0, %v652_v55  ;;  %v167_v3 = vshll.u32 %v695_v2, %v155_v49  ;;  %v170_v5 = vshll.u32 %v696_v4, %v155_v49  ;;  %vm173_vm3 = vcmp.lt.s32.totalorder %v770_v48, 1 }
  0xf0   :  { %v656_v6 = vpop.eup %655  ;;  %v134_v7 = vadd.f32 1.0, %v654_v62  ;;  %v159_v8 = vshrl.u32 %v693_v60, %v156_v57  ;;  %v162_v9 = vshrl.u32 %v694_v0, %v156_v57  ;;  %v157_v11 = vshrl.u32 %v692_v58, %v156_v57 }
  0xf1   :  { %v137_v10 = vmul.f32 %v133_v63, %v121_v50  ;;  %v165_v12 = vshrl.u32 %v695_v2, %v156_v57  ;;  %v168_v13 = vshrl.u32 %v696_v4, %v156_v57  ;;  %v136_v14 = vadd.f32 1.0, %v656_v6 }
  0xf2   :  { %v160_v15 = vor.u32 %v159_v8, %v158_v59  ;;  %v163_v16 = vor.u32 %v162_v9, %v161_v61  ;;  %v171_v18 = vshrl.u32 %v697_v17, %v156_v57  ;;  %v138_v19 = vmul.f32 %v134_v7, %v122_v51 }
  0xf3   :  { %567 = vrot.lane.b32.xlu1 %v137_v10, %s698_s0  ;;  %v166_v20 = vor.u32 %v165_v12, %v164_v1  ;;  %v169_v21 = vor.u32 %v168_v13, %v167_v3  ;;  %vm174_vm4 = vcmp.lt.s32.totalorder %v770_v48, 2  ;;  %vm175_vm5 = vcmp.lt.s32.totalorder %v770_v48, 3 }
  0xf4   :  { %v172_v22 = vor.u32 %v171_v18, %v170_v5  ;;  %vm176_vm6 = vcmp.lt.s32.totalorder %v770_v48, 4  ;;  %v177_v23 = vsel %vm173_vm3, %v157_v11, %v160_v15  ;;  %v181_v27 = vsel %vm173_vm3, %v160_v15, %v163_v16 }
  0xf5   :  { %v178_v26 = vsel %vm176_vm6, %v166_v20, 2102212464  ;;  %v182_v28 = vsel %vm176_vm6, %v169_v21, 920167782  ;;  %v185_v29 = vsel %vm173_vm3, %v163_v16, %v166_v20  ;;  %v259_v33 = vsub.s32 32, %v776_v56 }
  0xf6   :  { %v179_v30 = vsel %vm175_vm5, %v163_v16, %v178_v26  ;;  %v183_v31 = vsel %vm175_vm5, %v166_v20, %v182_v28  ;;  %v186_v32 = vsel %vm176_vm6, %v172_v22, 1326507024  ;;  %v261_v39 = vshll.u32 %v692_v58, %v776_v56 }
  0xf7   :  { %569 = vrot.lane.b32.xlu1 %v138_v19, %s698_s0  ;;  %v184_v35 = vsel %vm174_vm4, %v181_v27, %v183_v31  ;;  %v187_v36 = vsel %vm175_vm5, %v169_v21, %v186_v32  ;;  %v140_v40 = vmul.f32 %v136_v14, %v124_v52  ;;  %v180_v44 = vsel %vm174_vm4, %v177_v23, %v179_v30 }
  0xf8   :  { %v188_v41 = vsel %vm174_vm4, %v185_v29, %v187_v36  ;;  %v802_v42 = vmul.u32.u64.low %v773_v53, %v184_v35  ;;  %v803_v43 = vmul.u32.u64.high %v773_v53, %v184_v35, %v802_v42  ;;  %v262_v49 = vshrl.u32 %v693_v60, %v259_v33 }
  0xf9   :  { %v809_v46 = vmul.u32.u64.low %v773_v53, %v188_v41  ;;  %v810_v47 = vmul.u32.u64.high %v773_v53, %v188_v41, %v809_v46  ;;  %v264_v50 = vshll.u32 %v693_v60, %v776_v56  ;;  %v265_v51 = vshrl.u32 %v694_v0, %v259_v33 }
  0xfa   :  { %v267_v52 = vshll.u32 %v694_v0, %v776_v56  ;;  %v268_v55 = vshrl.u32 %v695_v2, %v259_v33  ;;  %v263_v57 = vor.u32 %v262_v49, %v261_v39  ;;  %v270_v59 = vshll.u32 %v695_v2, %v776_v56 }
  0xfb   :  { %573 = vrot.lane.b32.xlu1 %v140_v40, %s698_s0  ;;  %v271_v61 = vshrl.u32 %v696_v4, %v259_v33  ;;  %v273_v48 = vshll.u32 %v696_v4, %v776_v56  ;;  %v199_v62 = vadd.s32 1, %v803_v43  ;;  %v266_v63 = vor.u32 %v265_v51, %v264_v50 }
  0xfc   :  { %v269_v1 = vor.u32 %v268_v55, %v267_v52  ;;  %v274_v3 = vshrl.u32 %v697_v17, %v259_v33  ;;  %v196_v5 = vmul.u32 %v773_v53, %v180_v44  ;;  %vm198_vm7 = vc.u32 %v810_v47, %v802_v42 }
  0xfd   :  { %v272_v60 = vor.u32 %v271_v61, %v270_v59  ;;  %v292_v0 = vshll.u32 %v252_v54, 8  ;;  %v200_v6 = vsel %vm198_vm7, %v199_v62, %v803_v43  ;;  %v260_v2 = vshrl.u32 %v692_v58, %v259_v33 }
  0xfe   :  { %v275_v7 = vor.u32 %v274_v3, %v273_v48  ;;  %vm276_vm8 = vcmp.lt.s32.totalorder %v792_v34, 1  ;;  %v201_v56 = vadd.s32 %v200_v6, %v196_v5  ;;  %vm277_vm9 = vcmp.lt.s32.totalorder %v792_v34, 2 }
  0xff   :  { %vm279_vm10 = vcmp.lt.s32.totalorder %v792_v34, 4  ;;  %v284_v53 = vsel %vm276_vm8, %v263_v57, %v266_v63  ;;  %vm278_vm11 = vcmp.lt.s32.totalorder %v792_v34, 3  ;;  %v288_v45 = vsel %vm276_vm8, %v266_v63, %v269_v1 }
 0x100   :  { %v285_v4 = vsel %vm279_vm10, %v272_v60, 920167782  ;;  %v289_v54 = vsel %vm279_vm10, %v275_v7, 1326507024  ;;  %v202_v8 = vadd.s32 536870912, %v201_v56  ;;  %v280_v16 = vsel %vm276_vm8, %v260_v2, %v263_v57 }
 0x101   :  { %v281_v58 = vsel %vm279_vm10, %v269_v1, 2102212464  ;;  %v286_v9 = vsel %vm278_vm11, %v269_v1, %v285_v4  ;;  %v290_v10 = vsel %vm278_vm11, %v272_v60, %v289_v54  ;;  %v197_v43 = vadd.s32 %v802_v42, %v810_v47 }
 0x102   :  { %v287_v11 = vsel %vm277_vm9, %v284_v53, %v286_v9  ;;  %v291_v12 = vsel %vm277_vm9, %v288_v45, %v290_v10  ;;  %v203_v13 = vshrl.u32 %v202_v8, 30  ;;  %v282_v17 = vsel %vm278_vm11, %v266_v63, %v281_v58 }
 0x103   :  { %v837_v14 = vmul.u32.u64.low %v292_v0, %v291_v12  ;;  %v838_v15 = vmul.u32.u64.high %v292_v0, %v291_v12, %v837_v14  ;;  %v842_v18 = vmul.u32.u64.low %v292_v0, %v287_v11  ;;  %v843_v19 = vmul.u32.u64.high %v292_v0, %v287_v11, %v842_v18 }
 0x104   :  { %v204_v20 = vshll.u32 %v203_v13, 30  ;;  %v227_v21 = vsub.s32 4, %v203_v13  ;;  %v283_v27 = vsel %vm277_vm9, %v280_v16, %v282_v17  ;;  %vm246_vm4 = vcmp.lt.s32.totalorder %v757_v25, 0 }
 0x105   :  { %vm301_vm14 = vc.u32 %v838_v15, %v842_v18  ;;  %v302_v29 = vadd.s32 1, %v843_v19  ;;  %v299_v30 = vmul.u32 %v292_v0, %v283_v27  ;;  %v300_v42 = vadd.s32 %v842_v18, %v838_v15 }
 0x106   :  { %v205_v23 = vsub.s32 %v201_v56, %v204_v20  ;;  %v228_v26 = vsel %vm143_vm13, %v227_v21, %v203_v13  ;;  %v127_v18 = vmul.f32 0.70710677, %v757_v25  ;;  %vm233_vm9 = vweird.f32 %v755_v24 }
 0x107   :  { %v230_v28 = vsel %vm847_vm12, 0, %v228_v26  ;;  %v303_v31 = vsel %vm301_vm14, %v302_v29, %v843_v19 }
 0x108   :  { %v207_v37 = vsub.s32 0, %v205_v23  ;;  %v304_v33 = vadd.s32 %v303_v31, %v299_v30  ;;  %v440_v58 = vadd.s32 3, %v230_v28  ;;  %v234_v11 = vand.u32 3, %v230_v28 }
 0x10a   :  { %v605_v32 = vmin.u32 %v207_v37, %v205_v23  ;;  %v305_v36 = vadd.s32 536870912, %v304_v33  ;;  %v441_v14 = vand.u32 3, %v440_v58  ;;  %vm235_vm2 = vcmp.lt.s32.totalorder %v234_v11, 2 }
 0x10b   :  { %vm236_vm3 = vcmp.eq.s32.totalorder %v234_v11, 0  ;;  %vm239_vm5 = vcmp.eq.s32.totalorder %v234_v11, 2 }
 0x10c   :  { %v209_v35 = vclz %v605_v32  ;;  %v306_v40 = vshrl.u32 %v305_v36, 30  ;;  %vm442_vm6 = vcmp.lt.s32.totalorder %v441_v14, 2  ;;  %vm446_vm7 = vcmp.eq.s32.totalorder %v441_v14, 2 }
 0x10d   :  { %vm443_vm8 = vcmp.eq.s32.totalorder %v441_v14, 0 }
 0x10e   :  { %v606_v39 = vadd.s32 4294967294, %v209_v35  ;;  %v307_v41 = vshll.u32 %v306_v40, 30  ;;  %v330_v13 = vsub.s32 4, %v306_v40 }
 0x110   :  { %vm607_vm15 = vcmp.lt.s32.totalorder %v606_v39, 0  ;;  %v308_v49 = vsub.s32 %v304_v33, %v307_v41  ;;  %v331_v22 = vsel %vm246_vm4, %v330_v13, %v306_v40 }
 0x111   :  { %v212_v34 = vsel %vm607_vm15, 0, %v606_v39  ;;  %v333_v37 = vsel %vm871_vm1, 0, %v331_v22 }
 0x112   :  { %v213_v44 = vsub.s32 32, %v212_v34  ;;  %v217_v46 = vsub.s32 4294967266, %v212_v34  ;;  %v214_v50 = vshll.u32 %v205_v23, %v212_v34  ;;  %v310_v55 = vsub.s32 0, %v308_v49 }
 0x113   :  { %v544_v35 = vadd.s32 3, %v333_v37  ;;  %v337_v36 = vand.u32 3, %v333_v37 }
 0x114   :  { %v215_v51 = vshrl.u32 %v197_v43, %v213_v44  ;;  %v218_v52 = vadd.s32 127, %v217_v46  ;;  %v609_v61 = vmin.u32 %v310_v55, %v308_v49 }
 0x115   :  { %v545_v39 = vand.u32 3, %v544_v35  ;;  %vm342_vm10 = vcmp.eq.s32.totalorder %v337_v36, 2  ;;  %vm338_vm14 = vcmp.lt.s32.totalorder %v337_v36, 2 }
 0x116   :  { %v216_v57 = vor.u32 %v215_v51, %v214_v50  ;;  %v219_v59 = vshll.u32 %v218_v52, 23  ;;  %v312_v62 = vclz %v609_v61  ;;  %v123_v61 = vmul.f32 0.5, %v757_v25 }
 0x117   :  { %vm550_vm11 = vcmp.eq.s32.totalorder %v545_v39, 2  ;;  %vm546_vm15 = vcmp.lt.s32.totalorder %v545_v39, 2 }
 0x118   :  { %v220_v48 = vor.u32 4788187, %v219_v59  ;;  %v223_v1 = vcvt.s32.f32 %v216_v57  ;;  %v610_v3 = vadd.s32 4294967294, %v312_v62 }
 0x11a   :  { %v221_v63 = vand.u32 2147483647, %v220_v48  ;;  %vm611_vm0 = vcmp.lt.s32.totalorder %v610_v3, 0 }
 0x11b   :  { %v315_v0 = vsel %vm611_vm0, 0, %v610_v3  ;;  %vm336_vm0 = vweird.f32 %v757_v25 }
 0x11c   :  { %v224_v5 = vmul.f32 %v223_v1, %v221_v63  ;;  %v316_v47 = vsub.s32 32, %v315_v0  ;;  %v320_v6 = vsub.s32 4294967266, %v315_v0  ;;  %v317_v56 = vshll.u32 %v308_v49, %v315_v0 }
 0x11e   :  { %v225_v60 = vxor.u32 2147483648, %v224_v5  ;;  %v318_v53 = vshrl.u32 %v300_v42, %v316_v47  ;;  %v321_v4 = vadd.s32 127, %v320_v6 }
 0x120   :  { %v226_v2 = vsel %vm143_vm13, %v225_v60, %v224_v5  ;;  %v319_v45 = vor.u32 %v318_v53, %v317_v56  ;;  %v322_v54 = vshll.u32 %v321_v4, 23  ;;  %vm547_vm13 = vcmp.eq.s32.totalorder %v545_v39, 0 }
 0x121   :  { %v229_v7 = vsel %vm847_vm12, %v755_v24, %v226_v2  ;;  %vm339_vm12 = vcmp.eq.s32.totalorder %v337_v36, 0 }
 0x122   :  { %657 = vcosq.f32 %v229_v7  ;;  %v323_v8 = vor.u32 4788187, %v322_v54  ;;  %v326_v10 = vcvt.s32.f32 %v319_v45 }
 0x123   :  { %659 = vsinq.f32 %v229_v7 }
 0x124   :  { %v324_v9 = vand.u32 2147483647, %v323_v8 }
 0x126   :  { %v327_v12 = vmul.f32 %v326_v10, %v324_v9 }
 0x128   :  { %v328_v16 = vxor.u32 2147483648, %v327_v12 }
 0x12a   :  { %v329_v21 = vsel %vm246_vm4, %v328_v16, %v327_v12 }
 0x12b   :  { %v332_v38 = vsel %vm871_vm1, %v757_v25, %v329_v21  ;;  %vm575_vm1 = vcmask 523264  }
 0x12c   :  { %v658_v17 = vpop.eup %657  ;;  %661 = vcosq.f32 %v332_v38 }
 0x12d   :  { %v660_v19 = vpop.eup %659  ;;  %v240_v20 = vxor.u32 2147483648, %v658_v17  ;;  %663 = vsinq.f32 %v332_v38 }
 0x12e   :  { %v237_v23 = vxor.u32 2147483648, %v660_v19  ;;  %665 = verf.f32 %v127_v18 }
 0x12f   :  { %v448_v26 = vsel %vm446_vm7, %v240_v20, %v660_v19  ;;  %v241_v27 = vsel %vm239_vm5, %v240_v20, %v660_v19 }
 0x130   :  { %v445_v28 = vsel %vm443_vm8, %v658_v17, %v237_v23  ;;  %v238_v29 = vsel %vm236_vm3, %v658_v17, %v237_v23 }
 0x131   :  { %v449_v30 = vsel %vm442_vm6, %v445_v28, %v448_v26  ;;  %v242_v31 = vsel %vm235_vm2, %v238_v29, %v241_v27 }
 0x132   :  { %v450_v32 = vsel %vm233_vm9, nan, %v449_v30  ;;  %v243_v33 = vsel %vm233_vm9, nan, %v242_v31 }
 0x133   :  { %557 = vrot.lane.b32.xlu0 %v450_v32, %s698_s0 }
 0x136   :  { %v662_v40 = vpop.eup %661 }
 0x137   :  { %v664_v34 = vpop.eup %663  ;;  %v343_v41 = vxor.u32 2147483648, %v662_v40 }
 0x138   :  { %v666_v43 = vpop.eup %665  ;;  %v340_v44 = vxor.u32 2147483648, %v664_v34 }
 0x139   :  { %v344_v24 = vsel %vm342_vm10, %v343_v41, %v664_v34  ;;  %v552_v46 = vsel %vm550_vm11, %v343_v41, %v664_v34  ;;  %v135_v55 = vadd.f32 1.0, %v666_v43 }
 0x13a   :  { %v341_v49 = vsel %vm339_vm12, %v662_v40, %v340_v44  ;;  %v549_v50 = vsel %vm547_vm13, %v662_v40, %v340_v44 }
 0x13b   :  { %v345_v51 = vsel %vm338_vm14, %v341_v49, %v344_v24  ;;  %v553_v52 = vsel %vm546_vm15, %v549_v50, %v552_v46  ;;  %v139_v48 = vmul.f32 %v135_v55, %v123_v61 }
 0x13c   :  { %v346_v57 = vsel %vm336_vm0, nan, %v345_v51  ;;  %v554_v59 = vsel %vm336_vm0, nan, %v553_v52 }
 0x13d   :  { %559 = vrot.lane.b32.xlu0 %v554_v59, %s698_s0 }
 0x141   :  { %571 = vrot.lane.b32.xlu0 %v139_v48, %s698_s0 }
 0x165   :  { %v568_v62 = vpop.permute.xlu1 %567 }
 0x169   :  { %v570_v63 = vpop.permute.xlu1 %569 }
 0x16a   :  { %v576_v1 = vsel %vm575_vm1, %v568_v62, %v570_v63 }
 0x16b   :  { %583 = vst [vmem:[#allocation2 + $0x8] sm:$0xff] %v576_v1 }
 0x16d   :  { %v574_v42 = vpop.permute.xlu1 %573 }
 0x1a5   :  { %v558_v3 = vpop.permute.xlu0 %557 }
 0x1a6   :  { %v580_v5 = vsel %vm575_vm1, %v243_v33, %v558_v3 }
 0x1a7   :  { %582 = vst [vmem:[#allocation2] sm:$0xff] %v580_v5 }
 0x1af   :  { %v560_v60 = vpop.permute.xlu0 %559 }
 0x1b0   :  { %v581_v0 = vsel %vm575_vm1, %v346_v57, %v560_v60 }
 0x1b1   :  { %584 = vst [vmem:[#allocation2 + $0x10] sm:$0xff] %v581_v0 }
 0x1b3   :  { %v572_v47 = vpop.permute.xlu0 %571 }
 0x1b4   :  { %v577_v25 = vsel %vm575_vm1, %v572_v47, %v574_v42 }
 0x1b5   :  { %585 = vst [vmem:[#allocation2 + $0x18] sm:$0xff] %v577_v25 }
 0x1b6   :  { %678 = shalt.err (!%p675_p4)
}
 0x1b7   :  { %s679_s10 = scalar_lea.hbm %s905_s3, 512 }
 0x1b8   :  { %p680_p5 = scmp.ne.s32.totalorder %s905_s3, %s679_s10  ;;  %p683_p6 = scmp.lt.u32.totalorder %s679_s10, %s905_s3 }
 0x1ba   :  { %p685_p7 = pnand %p683_p6, %p680_p5 }
 0x1bc   :  { %688 = shalt.err (!%p685_p7)
}
 0x1bd   :  { %s700_s15 = smov 256   ;;  %s701_s16 = smov 16  }
 0x1be   :  { %597 = dma.vmem_to_hbm [thread:$0]  %s592_s6, 512, %s905_s3, [#allocation3], %s700_s15, %s700_s15, %s701_s16  }
 0x1bf   :  { %689 = dma.done.wait [#allocation3], 512  }
 0x1c0   :  { %690 = vsyncadd [#allocation3], 4294966784 }
 0x1c1   :  { %601 = vsyncpa [#allocation3], 1 }

</bundles_post_ra>
